<compile_context>
chip_gen: v7x
topology: tpu7x:2x2x1
jax: 0.10.0
libtpu: 0.0.40
codegen_flags: <defaults>
</compile_context>

<pallas_src>
import numpy as np
import jax
import jax.numpy as jnp
from jax.experimental import pallas as pl
from jax.experimental.pallas import tpu as pltpu

# ---- problem sizes (module defaults) ----------------------------------------
LATENT_DIM = 64        # game_encoder output dim
USER_EMB_DIM = 32      # nn.Embedding dim
MLP_HIDDEN = 128       # mlp_hidden_dim
GAME_FEAT_DIM = 32     # raw game-feature dim fed to the (placeholder) encoder
NUM_USERS = 10
NUM_USERS_PAD = 16     # one-hot rows rounded up to the bf16 sublane pack


def ncf_kernel(gf_ref, ids_ref, w1g_ref, w1u_ref, w2_ref, bias_ref, out_ref):
    f32 = jnp.float32
    tm = gf_ref.shape[1]              # batch tile (lanes)
    nu = w1u_ref.shape[1]             # padded #users
    h2_dim = w2_ref.shape[0]          # MLP_HIDDEN // 2

    # --- fused user-embedding gather: one-hot with the batch on lanes --------
    ids = ids_ref[...]                                              # (1, TM) i32
    row = jax.lax.broadcasted_iota(jnp.int32, (nu, tm), 0)          # (NU, TM)
    onehot = (row == ids).astype(w1u_ref.dtype)                     # (NU, TM)

    # --- MLP layer 1 (encoder + embedding table folded offline into weights) -
    b1 = bias_ref[:, 0:1]                                           # (H, 1) f32
    h1 = jnp.dot(w1g_ref[...], gf_ref[...], preferred_element_type=f32)
    h1 = h1 + jnp.dot(w1u_ref[...], onehot, preferred_element_type=f32)
    h1 = jnp.maximum(h1 + b1, 0.0)                                  # (H, TM)

    # --- MLP layer 2 ----------------------------------------------------------
    b2 = bias_ref[:h2_dim, 1:2]                                     # (H/2, 1)
    h2 = jnp.maximum(
        jnp.dot(w2_ref[...], h1.astype(w2_ref.dtype),
                preferred_element_type=f32) + b2, 0.0)              # (H/2, TM)

    # --- MLP layer 3 (H/2 -> 1): VPU mul + sublane reduce, lane-dense output --
    w3 = bias_ref[:h2_dim, 2:3]                                     # (H/2, 1)
    b3 = bias_ref[0:1, 3:4]                                         # (1, 1)
    out_ref[...] = jnp.sum(h2 * w3, axis=0, keepdims=True) + b3     # (1, TM)


def init_params(key):
    """Master f32 parameters in PyTorch (out, in) layout."""
    ks = jax.random.split(key, 8)
    s = 0.05
    H, H2 = MLP_HIDDEN, MLP_HIDDEN // 2
    return {
        "user_emb_table": s * jax.random.normal(ks[0], (NUM_USERS, USER_EMB_DIM), jnp.float32),
        "enc_w": s * jax.random.normal(ks[1], (LATENT_DIM, GAME_FEAT_DIM), jnp.float32),
        "enc_b": s * jax.random.normal(ks[2], (LATENT_DIM,), jnp.float32),
        "w1": s * jax.random.normal(ks[3], (H, LATENT_DIM + USER_EMB_DIM), jnp.float32),
        "b1": s * jax.random.normal(ks[4], (H,), jnp.float32),
        "w2": s * jax.random.normal(ks[5], (H2, H), jnp.float32),
        "b2": s * jax.random.normal(ks[6], (H2,), jnp.float32),
        "w3": s * jax.random.normal(ks[7], (1, H2), jnp.float32),
        "b3": jnp.zeros((1,), jnp.float32),
    }


def prepare_params(p):
    """Fold / pack / cast the module parameters for the kernel (one-time)."""
    bf16 = jnp.bfloat16
    H, H2 = MLP_HIDDEN, MLP_HIDDEN // 2
    w1g = p["w1"][:, :LATENT_DIM]                 # (H, L)
    w1u = p["w1"][:, LATENT_DIM:]                 # (H, U)
    # Exact linear folds (no nonlinearity between encoder/embedding and MLP-1):
    #   relu([gf@We^T + be, Emb[id]] @ W1^T + b1)
    # = relu(gf @ (W1g@We)^T + onehot(id) @ (W1u@Emb^T)^T + (b1 + W1g@be))
    w1g_fold = w1g @ p["enc_w"]                   # (H, F)
    w1u_fold = w1u @ p["user_emb_table"].T        # (H, NUM_USERS)
    w1u_pad = jnp.zeros((H, NUM_USERS_PAD), jnp.float32)
    w1u_pad = w1u_pad.at[:, :NUM_USERS].set(w1u_fold)
    b1_fold = p["b1"] + w1g @ p["enc_b"]

    bias = jnp.zeros((H, 4), jnp.float32)
    bias = bias.at[:, 0].set(b1_fold)
    bias = bias.at[:H2, 1].set(p["b2"])
    bias = bias.at[:H2, 2].set(p["w3"][0])
    bias = bias.at[0, 3].set(p["b3"][0])
    return {
        "w1g": w1g_fold.astype(bf16),             # (H, F)
        "w1u": w1u_pad.astype(bf16),              # (H, NU_PAD)
        "w2": p["w2"].astype(bf16),               # (H/2, H)
        "bias": bias,                             # (H, 4) f32 pack
    }


def rating_predictor_forward(game_features, user_ids, kp, *, tm=128):
    """game_features: (B, F) float, user_ids: (B,) int.  Returns (B,) f32."""
    B = game_features.shape[0]
    n_tiles = pl.cdiv(B, tm)
    b_pad = n_tiles * tm

    # glue (layout plumbing): transpose to (features, batch) and pad the batch
    gf_t = jnp.zeros((GAME_FEAT_DIM, b_pad), jnp.bfloat16)
    gf_t = gf_t.at[:, :B].set(game_features.astype(jnp.bfloat16).T)
    ids_t = jnp.zeros((1, b_pad), jnp.int32)
    ids_t = ids_t.at[0, :B].set(user_ids.astype(jnp.int32))

    def full(a):  # whole (small) array, resident in VMEM across all grid steps
        return pl.BlockSpec(a.shape, lambda i: (0, 0))

    out = pl.pallas_call(
        ncf_kernel,
        out_shape=jax.ShapeDtypeStruct((1, b_pad), jnp.float32),
        grid=(n_tiles,),
        in_specs=[
            pl.BlockSpec((GAME_FEAT_DIM, tm), lambda i: (0, i)),   # gf^T tile
            pl.BlockSpec((1, tm), lambda i: (0, i)),               # ids tile
            full(kp["w1g"]), full(kp["w1u"]), full(kp["w2"]), full(kp["bias"]),
        ],
        out_specs=pl.BlockSpec((1, tm), lambda i: (0, i)),          # lane-dense
        compiler_params=pltpu.CompilerParams(
            dimension_semantics=("parallel",)),
    )(gf_t, ids_t, kp["w1g"], kp["w1u"], kp["w2"], kp["bias"])
    return out[0, :B]


def reference_forward(game_features, user_ids, kp):
    """Pure-JAX reference mirroring the kernel's mixed-precision recipe
    (bf16 MXU inputs, f32 accumulation / elementwise).  Differs from the
    pure-f32 PyTorch module only by bf16 rounding of weights / activations."""
    bf16, f32 = jnp.bfloat16, jnp.float32
    H2 = MLP_HIDDEN // 2
    gf = game_features.astype(bf16)
    onehot = (user_ids[:, None] ==
              jnp.arange(NUM_USERS_PAD)[None, :]).astype(bf16)          # (B, NU)
    h1 = (jnp.dot(gf, kp["w1g"].T, preferred_element_type=f32)
          + jnp.dot(onehot, kp["w1u"].T, preferred_element_type=f32)
          + kp["bias"][:, 0])
    h1 = jnp.maximum(h1, 0.0)
    h2 = jnp.maximum(jnp.dot(h1.astype(bf16), kp["w2"].T,
                             preferred_element_type=f32)
                     + kp["bias"][:H2, 1], 0.0)
    return jnp.sum(h2 * kp["bias"][:H2, 2], axis=1) + kp["bias"][0, 3]


if __name__ == "__main__":
    key = jax.random.PRNGKey(0)
    kp_key, kf, ku = jax.random.split(key, 3)
    params = init_params(kp_key)
    kparams = prepare_params(params)

    B = 256      # two 128-wide batch tiles -> 2 "parallel" grid steps
    game_features = jax.random.normal(kf, (B, GAME_FEAT_DIM), jnp.float32)
    user_ids = jax.random.randint(ku, (B,), 0, NUM_USERS, jnp.int32)

    rating = jax.block_until_ready(
        rating_predictor_forward(game_features, user_ids, kparams))
    ref = jax.block_until_ready(
        reference_forward(game_features, user_ids, kparams))
    assert rating.shape == (B,)
    np.testing.assert_allclose(np.asarray(rating), np.asarray(ref),
                               rtol=1e-3, atol=2e-4)

    # small / ragged batch goes through the same wrapper (padded to one tile)
    rating_small = jax.block_until_ready(
        rating_predictor_forward(game_features[:8], user_ids[:8], kparams))
    np.testing.assert_allclose(np.asarray(rating_small), np.asarray(ref[:8]),
                               rtol=1e-3, atol=2e-4)

    print("KERNEL_OK")
</pallas_src>

<mosaic_0001>
module attributes {stable_mosaic.version = 11 : i64} {
  func.func @ncf_kernel(%arg0: i32, %arg1: memref<32x128xbf16, #tpu.memory_space<vmem>>, %arg2: memref<1x128xi32, #tpu.memory_space<vmem>>, %arg3: memref<128x32xbf16, #tpu.memory_space<vmem>>, %arg4: memref<128x16xbf16, #tpu.memory_space<vmem>>, %arg5: memref<64x128xbf16, #tpu.memory_space<vmem>>, %arg6: memref<128x4xf32, #tpu.memory_space<vmem>>, %arg7: memref<1x128xf32, #tpu.memory_space<vmem>>) attributes {dimension_semantics = [#tpu.dimension_semantics<parallel>], iteration_bounds = array<i64: 2>, scalar_prefetch = 0 : i64, scratch_operands = 0 : i64, tpu.core_type = #tpu.core_type<tc>, window_params = [{transform_indices = @transform_0, window_bounds = array<i64: 32, 128>}, {transform_indices = @transform_1, window_bounds = array<i64: 1, 128>}, {pipeline_mode = #tpu.pipeline_mode<synchronous>, transform_indices = @transform_2, window_bounds = array<i64: 128, 32>}, {pipeline_mode = #tpu.pipeline_mode<synchronous>, transform_indices = @transform_3, window_bounds = array<i64: 128, 16>}, {pipeline_mode = #tpu.pipeline_mode<synchronous>, transform_indices = @transform_4, window_bounds = array<i64: 64, 128>}, {pipeline_mode = #tpu.pipeline_mode<synchronous>, transform_indices = @transform_5, window_bounds = array<i64: 128, 4>}, {transform_indices = @transform_6, window_bounds = array<i64: 1, 128>}]} {
    %c0 = arith.constant 0 : index
    %c0_0 = arith.constant 0 : index
    %0 = vector.load %arg2[%c0, %c0_0] : memref<1x128xi32, #tpu.memory_space<vmem>>, vector<1x128xi32>
    %1 = tpu.iota {dimensions = array<i32: 0>} : vector<16x128xi32>
    %2 = vector.broadcast %0 : vector<1x128xi32> to vector<16x128xi32>
    %3 = arith.cmpi eq, %1, %2 : vector<16x128xi32>
    %4 = arith.extui %3 : vector<16x128xi1> to vector<16x128xi32>
    %5 = arith.sitofp %4 : vector<16x128xi32> to vector<16x128xf32>
    %6 = arith.truncf %5 : vector<16x128xf32> to vector<16x128xbf16>
    %c0_1 = arith.constant 0 : index
    %c0_2 = arith.constant 0 : index
    %7 = vector.load %arg6[%c0_1, %c0_2] : memref<128x4xf32, #tpu.memory_space<vmem>>, vector<128x1xf32>
    %c0_3 = arith.constant 0 : index
    %c0_4 = arith.constant 0 : index
    %8 = vector.load %arg3[%c0_3, %c0_4] : memref<128x32xbf16, #tpu.memory_space<vmem>>, vector<128x32xbf16>
    %c0_5 = arith.constant 0 : index
    %c0_6 = arith.constant 0 : index
    %9 = vector.load %arg1[%c0_5, %c0_6] : memref<32x128xbf16, #tpu.memory_space<vmem>>, vector<32x128xbf16>
    %cst = arith.constant dense<0.000000e+00> : vector<128x128xf32>
    %10 = tpu.matmul %8, %9, %cst {dimension_numbers = #tpu.dot_dimension_numbers<[1], [0], [0], [1], [0, 0, 1, 1], [], []>} : vector<128x32xbf16>, vector<32x128xbf16>, vector<128x128xf32> -> vector<128x128xf32>
    %c0_7 = arith.constant 0 : index
    %c0_8 = arith.constant 0 : index
    %11 = vector.load %arg4[%c0_7, %c0_8] : memref<128x16xbf16, #tpu.memory_space<vmem>>, vector<128x16xbf16>
    %cst_9 = arith.constant dense<0.000000e+00> : vector<128x128xf32>
    %12 = tpu.matmul %11, %6, %cst_9 {dimension_numbers = #tpu.dot_dimension_numbers<[1], [0], [0], [1], [0, 0, 1, 1], [], []>} : vector<128x16xbf16>, vector<16x128xbf16>, vector<128x128xf32> -> vector<128x128xf32>
    %13 = arith.addf %10, %12 : vector<128x128xf32>
    %14 = vector.broadcast %7 : vector<128x1xf32> to vector<128x128xf32>
    %15 = arith.addf %13, %14 : vector<128x128xf32>
    %cst_10 = arith.constant 0.000000e+00 : f32
    %16 = vector.broadcast %cst_10 : f32 to vector<128x128xf32>
    %17 = arith.maximumf %15, %16 : vector<128x128xf32>
    %c0_11 = arith.constant 0 : index
    %c1 = arith.constant 1 : index
    %18 = vector.load %arg6[%c0_11, %c1] : memref<128x4xf32, #tpu.memory_space<vmem>>, vector<64x1xf32>
    %c0_12 = arith.constant 0 : index
    %c0_13 = arith.constant 0 : index
    %19 = vector.load %arg5[%c0_12, %c0_13] : memref<64x128xbf16, #tpu.memory_space<vmem>>, vector<64x128xbf16>
    %20 = arith.truncf %17 : vector<128x128xf32> to vector<128x128xbf16>
    %cst_14 = arith.constant dense<0.000000e+00> : vector<64x128xf32>
    %21 = tpu.matmul %19, %20, %cst_14 {dimension_numbers = #tpu.dot_dimension_numbers<[1], [0], [0], [1], [0, 0, 1, 1], [], []>} : vector<64x128xbf16>, vector<128x128xbf16>, vector<64x128xf32> -> vector<64x128xf32>
    %22 = vector.broadcast %18 : vector<64x1xf32> to vector<64x128xf32>
    %23 = arith.addf %21, %22 : vector<64x128xf32>
    %cst_15 = arith.constant 0.000000e+00 : f32
    %24 = vector.broadcast %cst_15 : f32 to vector<64x128xf32>
    %25 = arith.maximumf %23, %24 : vector<64x128xf32>
    %c0_16 = arith.constant 0 : index
    %c2 = arith.constant 2 : index
    %26 = vector.load %arg6[%c0_16, %c2] : memref<128x4xf32, #tpu.memory_space<vmem>>, vector<64x1xf32>
    %c0_17 = arith.constant 0 : index
    %c3 = arith.constant 3 : index
    %27 = vector.load %arg6[%c0_17, %c3] : memref<128x4xf32, #tpu.memory_space<vmem>>, vector<1x1xf32>
    %28 = vector.broadcast %26 : vector<64x1xf32> to vector<64x128xf32>
    %29 = arith.mulf %25, %28 : vector<64x128xf32>
    %cst_18 = arith.constant dense<0.000000e+00> : vector<128xf32>
    %30 = vector.multi_reduction <add>, %29, %cst_18 [0] : vector<64x128xf32> to vector<128xf32>
    %31 = vector.shape_cast %30 : vector<128xf32> to vector<1x128xf32>
    %32 = vector.broadcast %27 : vector<1x1xf32> to vector<1x128xf32>
    %33 = arith.addf %31, %32 : vector<1x128xf32>
    %c0_19 = arith.constant 0 : index
    %c0_20 = arith.constant 0 : index
    %34 = vector.load %arg7[%c0_19, %c0_20] : memref<1x128xf32, #tpu.memory_space<vmem>>, vector<1x128xf32>
    tpu.vector_store %arg7[%c0_19, %c0_20], %33 {strides = array<i32>} : memref<1x128xf32, #tpu.memory_space<vmem>>, vector<1x128xf32>,
    return
  }
  func.func @transform_0(%arg0: i32) -> (i32, i32) {
    %c0_i32 = arith.constant 0 : i32
    %c0_i32_0 = arith.constant 0 : i32
    return %c0_i32, %arg0 : i32, i32
  }
  func.func @transform_1(%arg0: i32) -> (i32, i32) {
    %c0_i32 = arith.constant 0 : i32
    %c0_i32_0 = arith.constant 0 : i32
    return %c0_i32, %arg0 : i32, i32
  }
  func.func @transform_2(%arg0: i32) -> (i32, i32) {
    %c0_i32 = arith.constant 0 : i32
    %c0_i32_0 = arith.constant 0 : i32
    %c0_i32_1 = arith.constant 0 : i32
    return %c0_i32, %c0_i32_0 : i32, i32
  }
  func.func @transform_3(%arg0: i32) -> (i32, i32) {
    %c0_i32 = arith.constant 0 : i32
    %c0_i32_0 = arith.constant 0 : i32
    %c0_i32_1 = arith.constant 0 : i32
    return %c0_i32, %c0_i32_0 : i32, i32
  }
  func.func @transform_4(%arg0: i32) -> (i32, i32) {
    %c0_i32 = arith.constant 0 : i32
    %c0_i32_0 = arith.constant 0 : i32
    %c0_i32_1 = arith.constant 0 : i32
    return %c0_i32, %c0_i32_0 : i32, i32
  }
  func.func @transform_5(%arg0: i32) -> (i32, i32) {
    %c0_i32 = arith.constant 0 : i32
    %c0_i32_0 = arith.constant 0 : i32
    %c0_i32_1 = arith.constant 0 : i32
    return %c0_i32, %c0_i32_0 : i32, i32
  }
  func.func @transform_6(%arg0: i32) -> (i32, i32) {
    %c0_i32 = arith.constant 0 : i32
    %c0_i32_0 = arith.constant 0 : i32
    return %c0_i32, %arg0 : i32, i32
  }
}

</mosaic_0001>

<bundles_post_ra>
// kernel: tpu_custom_call.1
= control target key start
LH: loop header
LB: loop body
LE: loop exit
PB: predicated region body
PF: predicated region fallthrough
CT: control target
= control target key end

     0   :  { %11 = vsyncpa [#allocation4], 0  ;;  %s1748_s0 = inlined_call_operand.vmem [shape: bf16[32,256], index: 0, kind: input, shape index: {}]   ;;  %s1749_s1 = inlined_call_operand.vmem [shape: s32[1,256], index: 1, kind: input, shape index: {}]   ;;  %s1750_s2 = inlined_call_operand.vmem [shape: bf16[128,32], index: 2, kind: input, shape index: {}]   ;;  %s1751_s3 = inlined_call_operand.vmem [shape: bf16[128,16], index: 3, kind: input, shape index: {}]   ;;  %s1752_s4 = inlined_call_operand.vmem [shape: bf16[64,128], index: 4, kind: input, shape index: {}]   ;;  %s1753_s5 = inlined_call_operand.vmem [shape: f32[128,4], index: 5, kind: input, shape index: {}]   ;;  %s1754_s6 = inlined_call_operand.hbm [shape: f32[1,256], index: 6, kind: output, shape index: {}]  }
   0x1   :  { %13 = vsyncpa [#allocation4 + $0x1], 0  ;;  %s1498_s21 = smov 0   ;;  %s1500_s22 = smov 0  }
   0x2   :  { %s1502_s23 = smov 0   ;;  %s1504_s24 = smov 0  }
   0x3 LB: > { %s1519_s25 = sadd.s32 4294967295, %s1455_s24   ;;  %s1137_s26 = sadd.s32 4294967294, %s1455_s24   ;;  %s1455_s24 = sphi %s1504_s24, %s1760_s24   ;;  %s1451_s23 = sphi %s1502_s23, %s1759_s23   ;;  %s1447_s22 = sphi %s1500_s22, %s1758_s22   ;;  %s1443_s21 = sphi %s1498_s21, %s1757_s21  }
   0x4   : > { %s1523_s27 = sadd.s32 1, %s1455_s24   ;;  %s26_s28 = sadd.s32 1, %s1451_s23 }
   0x5   : > { %s23_s29 = ssub.s32 %s1455_s24, %s1523_s27  ;;  %p33_p0 = scmp.ne.s32.totalorder %s1451_s23, %s1447_s22 }
   0x6   : > { %p24_p1 = scmp.eq.s32.totalorder %s23_s29, 0  ;;  %p34_p2 = scmp.eq.s32.totalorder %s1455_s24, 0 }
   0x7   : > { %p173_p3 = scmp.eq.s32.totalorder %s1519_s25, 1  ;;  %p178_p4 = scmp.ne.s32.totalorder %s1447_s22, %s1443_s21 }
   0x8   : > { %s1535_s30 = scalar_select %p24_p1, %s1451_s23, %s26_s28  }
   0x9   : > { %p35_p5 = por %p34_p2, %p33_p0  ;;  %p1537_p6 = por %p173_p3, %p33_p0 }
   0xa   : > { %p179_p7 = scmp.eq.s32.totalorder %s1137_s26, 1  ;;  %p1139_p9 = scmp.ge.s32.totalorder %s1455_s24, 2 }
   0xc   : > { %p1541_p8 = por %p179_p7, %p178_p4  ;;  %207 = sbr.rel (%p1139_p9) target bundleno = 26 (0x1a), region = 32 }
  0x13   : > { %210 = sbr.rel (!%p35_p5) target bundleno = 26 (0x1a), region = 36  ;;  %s212_s9 = sand.u32 (%p35_p5), 1, %s1451_s23  }
  0x14   : > { %s1141_s10 = sshll.u32 (%p35_p5), %s1455_s24, 2  ;;  %s1140_s11 = sshll.u32 (%p35_p5), %s212_s9, 4 }
  0x15   : > { %s216_s14 = scalar_lea.vmem (%p35_p5), %s1748_s0, %s1141_s10  ;;  %s214_s15 = scalar_lea.vmem (%p35_p5), [#allocation2], %s1140_s11 }
  0x16   : > { %v232_v0 = vld [vmem:[%s216_s14] sm:$0xf] (%p35_p5)  ;;  %v234_v1 = vld [vmem:[%s216_s14 + $0x8] sm:$0xf] (%p35_p5)  ;;  %v236_v2 = vld [vmem:[%s216_s14 + $0x10] sm:$0xf] (%p35_p5) }
  0x17   : > { %233 = vst [vmem:[%s214_s15] sm:$0xf] (%p35_p5), %v232_v0  ;;  %235 = vst [vmem:[%s214_s15 + $0x4] sm:$0xf] (%p35_p5), %v234_v1  ;;  %v238_v3 = vld [vmem:[%s216_s14 + $0x18] sm:$0xf] (%p35_p5) }
  0x18   : > { %237 = vst [vmem:[%s214_s15 + $0x8] sm:$0xf] (%p35_p5), %v236_v2  ;;  %239 = vst [vmem:[%s214_s15 + $0xc] sm:$0xf] (%p35_p5), %v238_v3 }
  0x1a PF: > { %p1142_p10 = scmp.ge.s32.totalorder %s1455_s24, 1  ;;  %p275_p11 = scmp.lt.s32.totalorder %s1455_s24, 3 }
  0x1c   : > { %p276_p12 = pnand %p1142_p10, %p275_p11 }
  0x1d   : > { %s1556_s16 = sand.u32 (!%p276_p12), 1, %s1447_s22   ;;  %p313_p13 = scmp.lt.s32.totalorder (!%p276_p12), %s1519_s25, 1  ;;  %v318_v4 = vlaneseq (!%p276_p12)  ;;  %v1373_v5 = vld [vmem:[%s1751_s3] sm:$0xff] (!%p276_p12)   ;;  %vm424_vm0 = vcmask (!%p276_p12), 130048   ;;  %vm598_vm1 = vcmask (!%p276_p12), 261120   ;;  %v1374_v12 = vld [vmem:[%s1751_s3 + $0x8] sm:$0xff] (!%p276_p12)  }
  0x1e   : > { %279 = sbr.rel (%p276_p12) target bundleno = 565 (0x235), region = 81  ;;  %s1143_s17 = sshll.u32 (!%p276_p12), %s1556_s16, 4  ;;  %1223 = vmatprep.mubr.msk.bf16.mxu1 (!%p276_p12), %vm424_vm0, %v1373_v5  ;;  %v1375_v10 = vld [vmem:[%s1750_s2] sm:$0xff] (!%p276_p12)   ;;  %v1376_v13 = vld [vmem:[%s1750_s2 + $0x8] sm:$0xff] (!%p276_p12)   ;;  %v1457_v14 = vmov (!%p276_p12), 0   ;;  %v1377_v16 = vld [vmem:[%s1751_s3 + $0x10] sm:$0xff] (!%p276_p12)  }
  0x1f   : > { %v319_v6 = vshrl.u32 (!%p276_p12), %v318_v4, 7  ;;  %s284_s20 = scalar_lea.vmem (!%p276_p12), [#allocation2], %s1143_s17  ;;  %1243 = vmatprep.mubr.msk.bf16.mxu0 (!%p276_p12), %vm598_vm1, %v1375_v10  ;;  %1359 = vset.pattern.permute.xlu0 (!%p276_p12), %v1457_v14  ;;  %v1458_v15 = vmov (!%p276_p12), 1.0|1.0   ;;  %v1379_v17 = vld [vmem:[%s1750_s2 + $0x10] sm:$0xff] (!%p276_p12)   ;;  %v1378_v18 = vld [vmem:[%s1751_s3 + $0x18] sm:$0xff] (!%p276_p12)  }
  0x20   : > { %v1371_v7 = vld [vmem:[%s284_s20] sm:$0xff] (!%p276_p12)   ;;  %v1372_v9 = vld [vmem:[%s284_s20 + $0x8] sm:$0xff] (!%p276_p12)   ;;  %1360 = vset.pattern.permute.xlu1 (!%p276_p12), %v1457_v14  ;;  %v1459_v46 = vmov (!%p276_p12), 1   ;;  %v1460_v47 = vmov (!%p276_p12), 2   ;;  %v1461_v49 = vmov (!%p276_p12), 3   ;;  %s1187_s12 = sshll.u32 (!%p276_p12), %s1519_s25, 4 }
  0x21   : > { %v320_v8 = vadd.s32 (!%p276_p12), 8, %v319_v6  ;;  %1239 = vmatprep.subr.bf16.mxu0 (!%p276_p12), %v1371_v7  ;;  %v1380_v19 = vld [vmem:[%s1750_s2 + $0x18] sm:$0xff] (!%p276_p12)   ;;  %v1381_v20 = vld [vmem:[%s1751_s3 + $0x20] sm:$0xff] (!%p276_p12)   ;;  %v1606_v23 = vld [vmem:[%s1753_s5 + $0x10] sm:$0xff] (!%p276_p12)  ;;  %s312_s13 = scalar_lea.vmem (!%p276_p12), [#allocation3], %s1556_s16  ;;  %s1704_s18 = scalar_lea.hbm (!%p276_p12), %s1754_s6, %s1187_s12 }
  0x22   : > { %1240 = vmatpush3.bf16.msra.mxu0 (!%p276_p12), %v1371_v7  ;;  %v1383_v21 = vld [vmem:[%s1750_s2 + $0x20] sm:$0xff] (!%p276_p12)   ;;  %v333_v24 = vld [vmem:[%s1753_s5 + $0x8] sm:$0xff] (!%p276_p12)  ;;  %732 = vperm.xlu1 (!%p276_p12), %1360, %v1606_v23   ;;  %v1385_v27 = vld [vmem:[%s1751_s3 + $0x30] sm:$0xff] (!%p276_p12)   ;;  %s1067_s14 = sshll.u32 (!%p276_p12), %s312_s13, 4  ;;  %s1055_s19 = scalar_lea.sflag (!%p276_p12), [#allocation4], %s1556_s16  ;;  %s1706_s14 = int_to_ptr.vmem [resolvable:$true] %s1067_s14 }
  0x23   : > { %1241 = vmatprep.subr.bf16.mxu0 (!%p276_p12), %v1372_v9  ;;  %v332_v22 = vld [vmem:[%s1753_s5] sm:$0xff] (!%p276_p12)  ;;  %v1382_v25 = vld [vmem:[%s1751_s3 + $0x28] sm:$0xff] (!%p276_p12)   ;;  %v1387_v28 = vld [vmem:[%s1750_s2 + $0x30] sm:$0xff] (!%p276_p12)   ;;  %s1393_s20 = scalar_lea.vmem (!%p276_p12), %s1706_s14, 16 }
  0x24   : > { %722 = vperm.xlu0 (!%p276_p12), %1359, %v332_v22   ;;  %v1384_v26 = vld [vmem:[%s1750_s2 + $0x28] sm:$0xff] (!%p276_p12)   ;;  %v335_v29 = vld [vmem:[%s1753_s5 + $0x18] sm:$0xff] (!%p276_p12)  ;;  %v336_v30 = vld [vmem:[%s1753_s5 + $0x20] sm:$0xff] (!%p276_p12)  ;;  %p1394_p0 = scmp.ne.s32.totalorder (!%p276_p12), %s1706_s14, %s1393_s20 }
  0x25   : > { %s314_s26 = scalar_select %p313_p13, %s1519_s25, 1  ;;  %v337_v31 = vld [vmem:[%s1753_s5 + $0x28] sm:$0xff]  ;;  %v338_v32 = vld [vmem:[%s1753_s5 + $0x30] sm:$0xff]  ;;  %v339_v33 = vld [vmem:[%s1753_s5 + $0x38] sm:$0xff] }
  0x26   : > { %1242 = vmatpush3.bf16.msra.mxu0 %v1372_v9  ;;  %737 = vperm.xlu1 %1360, %v335_v29   ;;  %v1386_v34 = vld [vmem:[%s1751_s3 + $0x38] sm:$0xff]   ;;  %v340_v36 = vld [vmem:[%s1753_s5 + $0x40] sm:$0xff]  ;;  %v341_v37 = vld [vmem:[%s1753_s5 + $0x48] sm:$0xff]  ;;  %p1395_p1 = pnand %p1394_p0, %p1537_p6  ;;  %s1462_s25 = smov [#allocation3]  }
  0x27   : > { %s315_s9 = scalar_lea.vmem %s1749_s1, %s314_s26  ;;  %v1388_v35 = vld [vmem:[%s1750_s2 + $0x38] sm:$0xff]   ;;  %v342_v38 = vld [vmem:[%s1753_s5 + $0x50] sm:$0xff]  ;;  %v344_v40 = vld [vmem:[%s1753_s5 + $0x60] sm:$0xff]  ;;  %s1397_s26 = sshll.u32 %s1462_s25, 4  ;;  %s1398_s26 = int_to_ptr.vmem [resolvable:$false] %s1397_s26 }
  0x28   : > { %v1144_v11 = vld [vmem:[%s315_s9] ss:$0 sm:$0xff]  ;;  %727 = vperm.xlu0 %1359, %v333_v24   ;;  %v343_v39 = vld [vmem:[%s1753_s5 + $0x58] sm:$0xff]  ;;  %v345_v41 = vld [vmem:[%s1753_s5 + $0x68] sm:$0xff]  ;;  %p1396_p2 = pneg %p1395_p1  ;;  %s1399_s28 = scalar_lea.vmem %s1398_s26, 32 }
  0x29   : > { %vm325_vm2 = vcmp.eq.s32.totalorder %v319_v6, %v1144_v11  ;;  %vm326_vm3 = vcmp.eq.s32.totalorder %v320_v8, %v1144_v11  ;;  %1244 = vmatmul.mubr.msk.bf16.vlgmr.msra.gmra.mrb[0].mxu0 %vm598_vm1, %v1376_v13  ;;  %v346_v42 = vld [vmem:[%s1753_s5 + $0x70] sm:$0xff]  ;;  %v347_v43 = vld [vmem:[%s1753_s5 + $0x78] sm:$0xff]  ;;  %v1389_v44 = vld [vmem:[%s1752_s4] sm:$0xff]   ;;  %p1400_p3 = scmp.lt.s32.totalorder %s1706_s14, %s1398_s26  ;;  %p1401_p4 = scmp.lt.s32.totalorder %s1399_s28, %s1393_s20 }
  0x2a   : > { %vm1155_vm4 = vmpackc.low %vm326_vm3, %vm325_vm2  ;;  %1247 = vmatprep.mubr.msk.bf16.mxu0 %vm598_vm1, %v1379_v17  ;;  %747 = vperm.xlu1 %1360, %v337_v31   ;;  %v1390_v45 = vld [vmem:[%s1752_s4 + $0x10] sm:$0xff]   ;;  %v993_v48 = vld [vmem:[%s1753_s5] sm:$0x1] }
  0x2b   : > { %1221 = vmatprep.subr.msk.bf16.mxu1 %vm1155_vm4, %v1458_v15  ;;  %p1402_p5 = por %p1401_p4, %p1400_p3 }
  0x2c   : > { %1222 = vmatpush3.bf16.msk.msra.mxu1 %vm1155_vm4, %v1458_v15  ;;  %742 = vperm.xlu0 %1359, %v336_v30  }
  0x2d   : > { %p1403_p7 = pnand %p1402_p5, %p1396_p2 }
  0x2e   : > { %757 = vperm.xlu1 %1360, %v339_v33  }
  0x2f   : > { %1224 = vmatmul.mubr.msk.bf16.vlgmr.msra.gmra.mrb[0].mxu1 %vm424_vm0, %v1374_v12 }
  0x30   : > { %1227 = vmatprep.mubr.msk.bf16.mxu1 %vm424_vm0, %v1377_v16  ;;  %752 = vperm.xlu0 %1359, %v338_v32  }
  0x31   : > { %1248 = vmatmul.mubr.msk.bf16.gmra.mrb[4].mxu0 %vm598_vm1, %v1380_v19 }
  0x32   : > { %1251 = vmatprep.mubr.msk.bf16.mxu0 %vm598_vm1, %v1383_v21  ;;  %767 = vperm.xlu1 %1360, %v341_v37  }
  0x34   : > { %762 = vperm.xlu0 %1359, %v340_v36  }
  0x36   : > { %777 = vperm.xlu1 %1360, %v343_v39  }
  0x37   : > { %1228 = vmatmul.mubr.msk.bf16.gmra.mrb[4].mxu1 %vm424_vm0, %v1378_v18 }
  0x38   : > { %1231 = vmatprep.mubr.msk.bf16.mxu1 %vm424_vm0, %v1381_v20  ;;  %772 = vperm.xlu0 %1359, %v342_v38  }
  0x39   : > { %1252 = vmatmul.mubr.msk.bf16.gmra.mrb[8].mxu0 %vm598_vm1, %v1384_v26 }
  0x3a   : > { %1255 = vmatprep.mubr.msk.bf16.mxu0 %vm598_vm1, %v1387_v28  ;;  %787 = vperm.xlu1 %1360, %v345_v41  }
  0x3c   : > { %782 = vperm.xlu0 %1359, %v344_v40  }
  0x3e   : > { %797 = vperm.xlu1 %1360, %v347_v43  }
  0x3f   : > { %1232 = vmatmul.mubr.msk.bf16.gmra.mrb[8].mxu1 %vm424_vm0, %v1382_v25 }
  0x40   : > { %1235 = vmatprep.mubr.msk.bf16.mxu1 %vm424_vm0, %v1385_v27  ;;  %792 = vperm.xlu0 %1359, %v346_v42  }
  0x41   : > { %1256 = vmatmul.mubr.msk.bf16.gmra.mrb[12].mxu0 %vm598_vm1, %v1388_v35 }
  0x42   : > { %1275 = vmatprep.mubr.bf16.mxu0 %v1389_v44  ;;  %1361 = vset.pattern.permute.xlu1 %v1459_v46 }
  0x43   : > { %863 = vperm.xlu1 %1361, %v333_v24  }
  0x44   : > { %1363 = vset.pattern.permute.xlu0 %v1460_v47 }
  0x45   : > { %999 = vperm.xlu0 %1363, %v333_v24  }
  0x47   : > { %1236 = vmatmul.mubr.msk.bf16.gmra.mrb[12].mxu1 %vm424_vm0, %v1386_v34  ;;  %868 = vperm.xlu1 %1361, %v1606_v23  }
  0x48   : > { %1279 = vmatprep.mubr.bf16.mxu1 %v1390_v45 }
  0x49   : > { %1364 = vset.pattern.permute.xlu0 %v1459_v46 }
  0x4a   : > { %858 = vperm.xlu0 %1364, %v332_v22  }
  0x4b   : > { %1362 = vset.pattern.permute.xlu1 %v1460_v47 }
  0x4c   : > { %995 = vperm.xlu1 %1362, %v332_v22  }
  0x4e   : > { %873 = vperm.xlu0 %1364, %v335_v29  }
  0x50   : > { %1365 = vset.pattern.permute.xlu1 %v1459_v46 }
  0x51   : > { %878 = vperm.xlu1 %1365, %v336_v30  }
  0x52   : > { %883 = vperm.xlu0 %1364, %v337_v31  }
  0x55   : > { %1366 = vset.pattern.permute.xlu1 %v1460_v47 }
  0x56   : > { %1368 = vset.pattern.permute.xlu0 %v1460_v47  ;;  %1003 = vperm.xlu1 %1366, %v1606_v23  }
  0x57   : > { %1011 = vperm.xlu0 %1368, %v336_v30  }
  0x5a   : > { %1007 = vperm.xlu1 %1366, %v335_v29  }
  0x5b   : > { %1019 = vperm.xlu0 %1368, %v338_v32  }
  0x5e   : > { %1367 = vset.pattern.permute.xlu1 %v1459_v46 }
  0x5f   : > { %1370 = vset.pattern.permute.xlu0 %v1461_v49  ;;  %888 = vperm.xlu1 %1367, %v338_v32  }
  0x60   : > { %1049 = vperm.xlu0 %1370, %v993_v48  }
  0x63   : > { %893 = vperm.xlu1 %1367, %v339_v33  }
  0x67   : > { %1369 = vset.pattern.permute.xlu1 %v1460_v47 }
  0x68   : > { %1015 = vperm.xlu1 %1369, %v337_v31  }
  0x6c   : > { %1023 = vperm.xlu1 %1369, %v339_v33  }
  0xa1   : > { %v733_v51 = vpop.permute.xlu1 %732 }
  0xa3   : > { %v723_v50 = vpop.permute.xlu0 %722 }
  0xa5   : > { %v738_v53 = vpop.permute.xlu1 %737 }
  0xa7   : > { %v728_v52 = vpop.permute.xlu0 %727 }
  0xa9   : > { %v748_v55 = vpop.permute.xlu1 %747 }
  0xab   : > { %v743_v54 = vpop.permute.xlu0 %742 }
  0xad   : > { %v758_v57 = vpop.permute.xlu1 %757 }
  0xaf   : > { %v753_v56 = vpop.permute.xlu0 %752 }
  0xb1   : > { %v768_v11 = vpop.permute.xlu1 %767 }
  0xb3   : > { %v1690_v58 = vpop.permute.xlu0 %762 }
  0xb5   : > { %v778_v35 = vpop.permute.xlu1 %777 }
  0xb7   : > { %v773_v12 = vpop.permute.xlu0 %772 }
  0xbb   : > { %v783_v36 = vpop.permute.xlu0 %782 }
  0xfc   : > { %v1245_v60 = vpop.f32.mrb[0].mxu0 }
  0xfd   : > { %v657_v63 = vpop.f32.mrb[1].mxu0 }
  0xfe   : > { %v1246_v2 = vpop.f32.mrb[2].mxu0 }
  0xff   : > { %v660_v6 = vpop.f32.mrb[3].mxu0 }
 0x102   : > { %v1225_v59 = vpop.f32.mrb[0].mxu1 }
 0x103   : > { %v483_v61 = vpop.f32.mrb[1].mxu1  ;;  %v666_v62 = vadd.f32 %v1245_v60, %v1225_v59  ;;  %v788_v59 = vpop.permute.xlu1 %787 }
 0x104   : > { %v1226_v0 = vpop.f32.mrb[2].mxu1  ;;  %v658_v1 = vadd.f32 %v657_v63, %v483_v61  ;;  %v1249_v18 = vpop.f32.mrb[4].mxu0 }
 0x105   : > { %v802_v3 = vadd.f32 %v733_v51, %v666_v62  ;;  %v486_v4 = vpop.f32.mrb[3].mxu1  ;;  %v669_v5 = vadd.f32 %v1246_v2, %v1226_v0  ;;  %v673_v22 = vpop.f32.mrb[5].mxu0 }
 0x106   : > { %v800_v7 = vadd.f32 %v723_v50, %v658_v1  ;;  %v661_v8 = vadd.f32 %v660_v6, %v486_v4  ;;  %v1250_v26 = vpop.f32.mrb[6].mxu0  ;;  %v793_v61 = vpop.permute.xlu0 %792 }
 0x107   : > { %v803_v9 = vadd.f32 %v738_v53, %v669_v5  ;;  %v818_v13 = vmax.f32 %v802_v3, 0.0  ;;  %v676_v30 = vpop.f32.mrb[7].mxu0 }
 0x108   : > { %v801_v10 = vadd.f32 %v728_v52, %v661_v8  ;;  %v816_v15 = vmax.f32 %v800_v7, 0.0 }
 0x109   : > { %v819_v14 = vmax.f32 %v803_v9, 0.0 }
 0x10a   : > { %v817_v16 = vmax.f32 %v801_v10, 0.0  ;;  %v1229_v17 = vpop.f32.mrb[4].mxu1 }
 0x10b   : > { %v849_v19 = vpack.c.bf16 %v819_v14, %v818_v13  ;;  %v499_v20 = vpop.f32.mrb[5].mxu1  ;;  %v682_v21 = vadd.f32 %v1249_v18, %v1229_v17 }
 0x10c   : > { %v848_v23 = vpack.c.bf16 %v817_v16, %v816_v15  ;;  %v1230_v24 = vpop.f32.mrb[6].mxu1  ;;  %v674_v25 = vadd.f32 %v673_v22, %v499_v20  ;;  %v1253_v42 = vpop.f32.mrb[8].mxu0 }
 0x10d   : > { %v806_v27 = vadd.f32 %v753_v56, %v682_v21  ;;  %v502_v28 = vpop.f32.mrb[7].mxu1  ;;  %v685_v29 = vadd.f32 %v1250_v26, %v1230_v24  ;;  %v689_v46 = vpop.f32.mrb[9].mxu0  ;;  %v1391_v26 = vld [vmem:[%s1752_s4 + $0x8] sm:$0xff]  }
 0x10e   : > { %v804_v31 = vadd.f32 %v743_v54, %v674_v25  ;;  %v677_v32 = vadd.f32 %v676_v30, %v502_v28  ;;  %1259 = vmatprep.subr.bf16.mxu0 %v848_v23  ;;  %1283 = vmatprep.subr.bf16.mxu1 %v848_v23  ;;  %v1254_v50 = vpop.f32.mrb[10].mxu0  ;;  %v798_v15 = vpop.permute.xlu1 %797 }
 0x10f   : > { %v807_v33 = vadd.f32 %v758_v57, %v685_v29  ;;  %1260 = vmatpush3.bf16.msra.mxu0 %v848_v23  ;;  %1291 = vmatpush3.bf16.msra.mxu1 %v848_v23  ;;  %v822_v37 = vmax.f32 %v806_v27, 0.0  ;;  %v692_v54 = vpop.f32.mrb[11].mxu0  ;;  %v1392_v27 = vld [vmem:[%s1752_s4 + $0x18] sm:$0xff]  }
 0x110   : > { %v805_v34 = vadd.f32 %v748_v55, %v677_v32  ;;  %1261 = vmatprep.subr.bf16.mxu0 %v849_v19  ;;  %1284 = vmatprep.subr.bf16.mxu1 %v849_v19  ;;  %v820_v39 = vmax.f32 %v804_v31, 0.0  ;;  %v1000_v32 = vpop.permute.xlu0 %999 }
 0x111   : > { %v823_v38 = vmax.f32 %v807_v33, 0.0 }
 0x112   : > { %v821_v40 = vmax.f32 %v805_v34, 0.0  ;;  %v1233_v41 = vpop.f32.mrb[8].mxu1  ;;  %v864_v28 = vpop.permute.xlu1 %863 }
 0x113   : > { %v851_v43 = vpack.c.bf16 %v823_v38, %v822_v37  ;;  %v515_v44 = vpop.f32.mrb[9].mxu1  ;;  %v698_v45 = vadd.f32 %v1253_v42, %v1233_v41  ;;  %1262 = vmatpush3.bf16.msra.mxu0 %v849_v19  ;;  %1292 = vmatpush3.bf16.msra.mxu1 %v849_v19 }
 0x114   : > { %v850_v47 = vpack.c.bf16 %v821_v40, %v820_v39  ;;  %v1234_v48 = vpop.f32.mrb[10].mxu1  ;;  %v690_v49 = vadd.f32 %v689_v46, %v515_v44  ;;  %v1257_v3 = vpop.f32.mrb[12].mxu0 }
 0x115   : > { %v810_v51 = vadd.f32 %v773_v12, %v698_v45  ;;  %v518_v52 = vpop.f32.mrb[11].mxu1  ;;  %v701_v53 = vadd.f32 %v1254_v50, %v1234_v48  ;;  %v705_v6 = vpop.f32.mrb[13].mxu0 }
 0x116   : > { %v808_v55 = vadd.f32 %v1690_v58, %v690_v49  ;;  %v693_v56 = vadd.f32 %v692_v54, %v518_v52  ;;  %1263 = vmatprep.subr.bf16.mxu0 %v850_v47  ;;  %1285 = vmatprep.subr.bf16.mxu1 %v850_v47  ;;  %v1258_v10 = vpop.f32.mrb[14].mxu0  ;;  %v869_v29 = vpop.permute.xlu1 %868 }
 0x117   : > { %v811_v57 = vadd.f32 %v778_v35, %v701_v53  ;;  %1264 = vmatpush3.bf16.msra.mxu0 %v850_v47  ;;  %1293 = vmatpush3.bf16.msra.mxu1 %v850_v47  ;;  %v826_v62 = vmax.f32 %v810_v51, 0.0  ;;  %v708_v14 = vpop.f32.mrb[15].mxu0  ;;  %v859_v34 = vpop.permute.xlu0 %858 }
 0x118   : > { %v809_v60 = vadd.f32 %v768_v11, %v693_v56  ;;  %1265 = vmatprep.subr.bf16.mxu0 %v851_v43  ;;  %1286 = vmatprep.subr.bf16.mxu1 %v851_v43  ;;  %v824_v0 = vmax.f32 %v808_v55, 0.0 }
 0x119   : > { %v827_v63 = vmax.f32 %v811_v57, 0.0 }
 0x11a   : > { %v825_v1 = vmax.f32 %v809_v60, 0.0  ;;  %v1237_v2 = vpop.f32.mrb[12].mxu1  ;;  %v996_v30 = vpop.permute.xlu1 %995 }
 0x11b   : > { %v853_v4 = vpack.c.bf16 %v827_v63, %v826_v62  ;;  %v531_v5 = vpop.f32.mrb[13].mxu1  ;;  %v714_v58 = vadd.f32 %v1257_v3, %v1237_v2  ;;  %1266 = vmatpush3.bf16.msra.mxu0 %v851_v43  ;;  %1294 = vmatpush3.bf16.msra.mxu1 %v851_v43 }
 0x11c   : > { %v852_v7 = vpack.c.bf16 %v825_v1, %v824_v0  ;;  %v1238_v8 = vpop.f32.mrb[14].mxu1  ;;  %v706_v9 = vadd.f32 %v705_v6, %v531_v5 }
 0x11d   : > { %v814_v11 = vadd.f32 %v793_v61, %v714_v58  ;;  %v534_v12 = vpop.f32.mrb[15].mxu1  ;;  %v717_v13 = vadd.f32 %v1258_v10, %v1238_v8 }
 0x11e   : > { %v812_v16 = vadd.f32 %v783_v36, %v706_v9  ;;  %v709_v17 = vadd.f32 %v708_v14, %v534_v12  ;;  %1267 = vmatprep.subr.bf16.mxu0 %v852_v7  ;;  %1287 = vmatprep.subr.bf16.mxu1 %v852_v7  ;;  %v879_v31 = vpop.permute.xlu1 %878  ;;  %v874_v36 = vpop.permute.xlu0 %873 }
 0x11f   : > { %v815_v18 = vadd.f32 %v798_v15, %v717_v13  ;;  %1268 = vmatpush3.bf16.msra.mxu0 %v852_v7  ;;  %1295 = vmatpush3.bf16.msra.mxu1 %v852_v7  ;;  %v830_v20 = vmax.f32 %v814_v11, 0.0 }
 0x120   : > { %v813_v19 = vadd.f32 %v788_v59, %v709_v17  ;;  %1269 = vmatprep.subr.bf16.mxu0 %v853_v4  ;;  %1288 = vmatprep.subr.bf16.mxu1 %v853_v4  ;;  %v828_v22 = vmax.f32 %v812_v16, 0.0 }
 0x121   : > { %v831_v21 = vmax.f32 %v815_v18, 0.0 }
 0x122   : > { %v829_v23 = vmax.f32 %v813_v19, 0.0  ;;  %v1004_v33 = vpop.permute.xlu1 %1003  ;;  %v884_v38 = vpop.permute.xlu0 %883 }
 0x123   : > { %v855_v24 = vpack.c.bf16 %v831_v21, %v830_v20  ;;  %1270 = vmatpush3.bf16.msra.mxu0 %v853_v4  ;;  %1296 = vmatpush3.bf16.msra.mxu1 %v853_v4 }
 0x124   : > { %v854_v25 = vpack.c.bf16 %v829_v23, %v828_v22 }
 0x126   : > { %1271 = vmatprep.subr.bf16.mxu0 %v854_v25  ;;  %1289 = vmatprep.subr.bf16.mxu1 %v854_v25  ;;  %v1008_v35 = vpop.permute.xlu1 %1007  ;;  %v1012_v61 = vpop.permute.xlu0 %1011 }
 0x127   : > { %1272 = vmatpush3.bf16.msra.mxu0 %v854_v25  ;;  %1297 = vmatpush3.bf16.msra.mxu1 %v854_v25 }
 0x128   : > { %1273 = vmatprep.subr.bf16.mxu0 %v855_v24  ;;  %1290 = vmatprep.subr.bf16.mxu1 %v855_v24 }
 0x12a   : > { %v889_v37 = vpop.permute.xlu1 %888  ;;  %v1020_v9 = vpop.permute.xlu0 %1019 }
 0x12b   : > { %1274 = vmatpush3.bf16.msra.mxu0 %v855_v24  ;;  %1298 = vmatpush3.bf16.msra.mxu1 %v855_v24 }
 0x12e   : > { %1276 = vmatmul.mubr.bf16.vlgmr.msra.gmra.mrb[16].mxu0 %v1391_v26  ;;  %1280 = vmatmul.mubr.bf16.vlgmr.msra.gmra.mrb[16].mxu1 %v1392_v27  ;;  %v894_v52 = vpop.permute.xlu1 %893  ;;  %v1050_v24 = vpop.permute.xlu0 %1049 }
 0x132   : > { %v1016_v2 = vpop.permute.xlu1 %1015 }
 0x136   : > { %v1024_v13 = vpop.permute.xlu1 %1023 }
 0x201   : > { %v1277_v39 = vpop.f32.mrb[16].mxu0  ;;  %v1281_v40 = vpop.f32.mrb[16].mxu1 }
 0x202   : > { %v954_v41 = vpop.f32.mrb[17].mxu0  ;;  %v970_v42 = vpop.f32.mrb[17].mxu1  ;;  %v963_v43 = vadd.f32 %v1277_v39, %v869_v29  ;;  %v979_v63 = vadd.f32 %v1281_v40, %v889_v37 }
 0x203   : > { %v955_v44 = vadd.f32 %v954_v41, %v859_v34  ;;  %v1278_v45 = vpop.f32.mrb[18].mxu0  ;;  %v1282_v46 = vpop.f32.mrb[18].mxu1  ;;  %v971_v54 = vadd.f32 %v970_v42, %v879_v31 }
 0x204   : > { %v957_v47 = vpop.f32.mrb[19].mxu0  ;;  %v973_v48 = vpop.f32.mrb[19].mxu1  ;;  %v966_v50 = vadd.f32 %v1278_v45, %v874_v36  ;;  %v987_v53 = vmax.f32 %v963_v43, 0.0  ;;  %v982_v4 = vadd.f32 %v1282_v46, %v894_v52  ;;  %v991_v6 = vmax.f32 %v979_v63, 0.0 }
 0x205   : > { %v985_v49 = vmax.f32 %v955_v44, 0.0  ;;  %v958_v51 = vadd.f32 %v957_v47, %v864_v28  ;;  %v974_v60 = vadd.f32 %v973_v48, %v884_v38  ;;  %v989_v0 = vmax.f32 %v971_v54, 0.0 }
 0x206   : > { %v988_v57 = vmax.f32 %v966_v50, 0.0  ;;  %v1028_v62 = vmul.f32 %v1004_v33, %v987_v53  ;;  %v992_v10 = vmax.f32 %v982_v4, 0.0  ;;  %v1032_v15 = vmul.f32 %v1020_v9, %v991_v6 }
 0x207   : > { %v986_v55 = vmax.f32 %v958_v51, 0.0  ;;  %v1026_v56 = vmul.f32 %v996_v30, %v985_v49  ;;  %v990_v5 = vmax.f32 %v974_v60, 0.0  ;;  %v1030_v7 = vmul.f32 %v1012_v61, %v989_v0 }
 0x208   : > { %v1029_v3 = vmul.f32 %v1008_v35, %v988_v57  ;;  %v1033_v16 = vmul.f32 %v1024_v13, %v992_v10 }
 0x209   : > { %v1027_v59 = vmul.f32 %v1000_v32, %v986_v55  ;;  %v1031_v12 = vmul.f32 %v1016_v2, %v990_v5 }
 0x20b   : > { %v1034_v1 = vadd.f32 %v1027_v59, %v1026_v56 }
 0x20d   : > { %v1035_v58 = vadd.f32 %v1034_v1, %v1028_v62 }
 0x20f   : > { %v1036_v8 = vadd.f32 %v1035_v58, %v1029_v3 }
 0x211   : > { %v1037_v11 = vadd.f32 %v1036_v8, %v1030_v7 }
 0x213   : > { %v1038_v14 = vadd.f32 %v1037_v11, %v1031_v12 }
 0x215   : > { %v1039_v17 = vadd.f32 %v1038_v14, %v1032_v15 }
 0x217   : > { %v1040_v18 = vadd.f32 %v1039_v17, %v1033_v16 }
 0x219   : > { %v1041_v19 = vrot.slane %v1040_v18, 4 }
 0x21b   : > { %v1042_v20 = vadd.f32 %v1041_v19, %v1040_v18 }
 0x21d   : > { %v1043_v21 = vrot.slane %v1042_v20, 2 }
 0x21f   : > { %v1044_v22 = vadd.f32 %v1043_v21, %v1042_v20 }
 0x221   : > { %v1045_v23 = vrot.slane %v1044_v22, 1 }
 0x223   : > { %v1046_v25 = vadd.f32 %v1045_v23, %v1044_v22 }
 0x225   : > { %v1052_v26 = vadd.f32 %v1050_v24, %v1046_v25 }
 0x227   : > { %1053 = vst [vmem:[%s312_s13] sm:$0x1] %v1052_v26 }
 0x228   : > { %1406 = shalt.err (!%p1403_p7)
}
 0x229   : > { %s1407_s16 = scalar_lea.hbm %s1704_s18, 16  ;;  %s1411_s10 = scalar_lea.hbm %s1754_s6, 32 }
 0x22a   : > { %p1408_p10 = scmp.ne.s32.totalorder %s1704_s18, %s1407_s16  ;;  %p1412_p13 = scmp.lt.u32.totalorder %s1704_s18, %s1754_s6 }
 0x22b   : > { %p1413_p0 = scmp.lt.u32.totalorder %s1411_s10, %s1407_s16  ;;  %p1415_p2 = scmp.lt.u32.totalorder %s1407_s16, %s1704_s18 }
 0x22c   : > { %p1409_p11 = pnand %p1408_p10, %p1537_p6 }
 0x22d   : > { %p1414_p1 = por %p1413_p0, %p1412_p13 }
 0x22e   : > { %p1410_p12 = pneg %p1409_p11 }
 0x22f   : > { %p1416_p3 = por %p1415_p2, %p1414_p1 }
 0x231   : > { %p1417_p4 = pnand %p1416_p3, %p1410_p12 }
 0x233   : > { %1420 = shalt.err (!%p1417_p4)
}
 0x234   : > { %1315 = dma.vmem_to_hbm [thread:$0]  (%p1537_p6), %s1706_s14, 16, %s1704_s18, %s1055_s19  }
 0x235 PF: > { %s1079_s13 = sand.u32 1, %s1443_s21   ;;  %p1318_p5 = pnand %p1139_p9, %p1541_p8 }
 0x236   : > { %s1080_s15 = scalar_lea.sflag [#allocation4], %s1079_s13 }
 0x237   : > { %1438 = dma.done.wait (!%p1318_p5), %s1080_s15, 16  }
 0x238   : > { %1440 = vsyncadd (!%p1318_p5), %s1080_s15, 4294967280  ;;  %p16_p7 = scmp.ge.s32.totalorder %s1523_s27, 4   ;;  %s1757_s21 = smov %s1447_s22 }
 0x239   : > { %s1758_s22 = smov %s1451_s23  ;;  %s1759_s23 = smov %s1535_s30 }
 0x23a   : > { %s1760_s24 = smov %s1523_s27  ;;  %18 = sbr.rel (!%p16_p7) target bundleno = 3 (0x3), region = 128 }
 0x241   :  { %1084 = vsyncpa [#allocation4], 1 }
 0x242   :  { %1086 = vsyncpa [#allocation4 + $0x1], 1 }

</bundles_post_ra>
